<compile_context>
chip_gen: v5e
topology: v5e:2x2
jax: 0.10.0
libtpu: 0.0.40
codegen_flags: <defaults>
</compile_context>

<pallas_src>
import jax
import jax.numpy as jnp
from jax.experimental import pallas as pl
from jax.experimental.pallas import tpu as pltpu


def _round_up(x, n):
    return ((x + n - 1) // n) * n


def _lora_kernel(x_ref, wa_ref, wb_ref, o_ref):
    # x_ref : [TM, K]       input rows (K on lanes)
    # wa_ref: [K, r]        lora_A weight, pre-transposed (resident)
    # wb_ref: [r, O_pad]    lora_B weight, pre-transposed + lane-padded (resident)
    # o_ref : [TM, O_pad]
    a = jnp.dot(x_ref[...], wa_ref[...], preferred_element_type=jnp.float32)
    o = jnp.dot(a.astype(x_ref.dtype), wb_ref[...], preferred_element_type=jnp.float32)
    o_ref[...] = o.astype(o_ref.dtype)


def lora_layer_forward(x, w_a, w_b, *, tm_max=512):
    """x: [batch, seq, input_features]; w_a: [r, in]; w_b: [out, r]."""
    batch, seq, in_features = x.shape
    r, in_features_a = w_a.shape
    out_features, r_b = w_b.shape
    assert in_features == in_features_a and r == r_b

    m = batch * seq
    x2d = x.reshape(m, in_features)
    itemsize = jnp.dtype(x.dtype).itemsize

    # --- layout prep (done once, outside the kernel) -------------------------
    # Lane-dense output: pad O up to a multiple of 128.
    o_pad = _round_up(out_features, 128)
    wa_t = w_a.T                                                # [K, r]
    wb_t = jnp.zeros((r, o_pad), dtype=w_b.dtype).at[:, :out_features].set(w_b.T)

    # --- M tiling -------------------------------------------------------------
    tm = min(tm_max, _round_up(m, 8))          # sublane-aligned tile height
    m_pad = _round_up(m, tm)
    if m_pad != m:
        x2d = jnp.pad(x2d, ((0, m_pad - m), (0, 0)))
    grid = (m_pad // tm,)

    # --- VMEM budget: double-buffered x/out tiles + resident weights ----------
    tile_bytes = 2 * tm * (in_features + o_pad) * itemsize
    weight_bytes = (in_features * r + r * o_pad) * itemsize
    vmem_limit = min(64 * 1024 * 1024,
                     max(16 * 1024 * 1024, 2 * (tile_bytes + weight_bytes)))

    cost = pl.CostEstimate(
        flops=2 * m * in_features * r + 2 * m * r * out_features,
        transcendentals=0,
        bytes_accessed=(m * in_features + in_features * r
                        + r * out_features + m * out_features) * itemsize,
    )

    out2d = pl.pallas_call(
        _lora_kernel,
        out_shape=jax.ShapeDtypeStruct((m_pad, o_pad), x.dtype),
        grid_spec=pltpu.PrefetchScalarGridSpec(
            num_scalar_prefetch=0,
            grid=grid,
            in_specs=[
                pl.BlockSpec((tm, in_features), lambda i: (i, 0)),   # x tile
                pl.BlockSpec((in_features, r), lambda i: (0, 0)),    # W_A^T (resident)
                pl.BlockSpec((r, o_pad), lambda i: (0, 0)),          # W_B^T (resident)
            ],
            out_specs=pl.BlockSpec((tm, o_pad), lambda i: (i, 0)),
        ),
        compiler_params=pltpu.CompilerParams(
            dimension_semantics=("parallel",),
            vmem_limit_bytes=int(vmem_limit),
        ),
        cost_estimate=cost,
    )(x2d, wa_t, wb_t)

    return out2d[:m, :out_features].reshape(batch, seq, out_features)


if __name__ == "__main__":
    # Small deterministic config consistent with the module:
    #   input_features=32, output_features=32, r=8, lora_dropout=0 (identity).
    batch, seq = 2, 8
    input_features, output_features, r = 32, 32, 8

    key = jax.random.PRNGKey(0)
    kx, ka, kb = jax.random.split(key, 3)

    x = jax.random.normal(kx, (batch, seq, input_features), dtype=jnp.float32)

    # Deterministic synthetic params (module's reset_parameters would zero
    # lora_B; use non-zero values so the check is nontrivial).
    bound_a = (6.0 / input_features) ** 0.5
    w_a = jax.random.uniform(
        ka, (r, input_features), minval=-bound_a, maxval=bound_a, dtype=jnp.float32
    )
    w_b = 0.02 * jax.random.normal(kb, (output_features, r), dtype=jnp.float32)

    out = lora_layer_forward(x, w_a, w_b)
    out = jax.block_until_ready(out)

    # Pure-JAX reference of the PyTorch forward semantics (no scaling, no dropout).
    ref = jnp.einsum("bsk,rk->bsr", x, w_a)
    ref = jnp.einsum("bsr,or->bso", ref, w_b)

    assert out.shape == (batch, seq, output_features)
    assert jnp.allclose(out, ref, atol=1e-5, rtol=1e-5)

    print("KERNEL_OK")
</pallas_src>

<mosaic_0001>
module attributes {stable_mosaic.version = 11 : i64} {
  func.func @_lora_kernel(%arg0: i32, %arg1: memref<16x32xf32, #tpu.memory_space<vmem>>, %arg2: memref<32x8xf32, #tpu.memory_space<vmem>>, %arg3: memref<8x128xf32, #tpu.memory_space<vmem>>, %arg4: memref<16x128xf32, #tpu.memory_space<vmem>>) attributes {dimension_semantics = [#tpu.dimension_semantics<parallel>], iteration_bounds = array<i64: 1>, scalar_prefetch = 0 : i64, scratch_operands = 0 : i64, tpu.core_type = #tpu.core_type<tc>, window_params = [{transform_indices = @transform_0, window_bounds = array<i64: 16, 32>}, {pipeline_mode = #tpu.pipeline_mode<synchronous>, transform_indices = @transform_1, window_bounds = array<i64: 32, 8>}, {pipeline_mode = #tpu.pipeline_mode<synchronous>, transform_indices = @transform_2, window_bounds = array<i64: 8, 128>}, {transform_indices = @transform_3, window_bounds = array<i64: 16, 128>}]} {
    %c0 = arith.constant 0 : index
    %c0_0 = arith.constant 0 : index
    %0 = vector.load %arg1[%c0, %c0_0] : memref<16x32xf32, #tpu.memory_space<vmem>>, vector<16x32xf32>
    %c0_1 = arith.constant 0 : index
    %c0_2 = arith.constant 0 : index
    %1 = vector.load %arg2[%c0_1, %c0_2] : memref<32x8xf32, #tpu.memory_space<vmem>>, vector<32x8xf32>
    %cst = arith.constant dense<0.000000e+00> : vector<16x8xf32>
    %2 = tpu.matmul %0, %1, %cst {dimension_numbers = #tpu.dot_dimension_numbers<[1], [0], [0], [1], [0, 0, 1, 1], [], []>} : vector<16x32xf32>, vector<32x8xf32>, vector<16x8xf32> -> vector<16x8xf32>
    %c0_3 = arith.constant 0 : index
    %c0_4 = arith.constant 0 : index
    %3 = vector.load %arg3[%c0_3, %c0_4] : memref<8x128xf32, #tpu.memory_space<vmem>>, vector<8x128xf32>
    %cst_5 = arith.constant dense<0.000000e+00> : vector<16x128xf32>
    %4 = tpu.matmul %2, %3, %cst_5 {dimension_numbers = #tpu.dot_dimension_numbers<[1], [0], [0], [1], [0, 0, 1, 1], [], []>} : vector<16x8xf32>, vector<8x128xf32>, vector<16x128xf32> -> vector<16x128xf32>
    %c0_6 = arith.constant 0 : index
    %c0_7 = arith.constant 0 : index
    %5 = vector.load %arg4[%c0_6, %c0_7] : memref<16x128xf32, #tpu.memory_space<vmem>>, vector<16x128xf32>
    tpu.vector_store %arg4[%c0_6, %c0_7], %4 {strides = array<i32>} : memref<16x128xf32, #tpu.memory_space<vmem>>, vector<16x128xf32>,
    return
  }
  func.func @transform_0(%arg0: i32) -> (i32, i32) {
    %c0_i32 = arith.constant 0 : i32
    %c0_i32_0 = arith.constant 0 : i32
    return %arg0, %c0_i32 : i32, i32
  }
  func.func @transform_1(%arg0: i32) -> (i32, i32) {
    %c0_i32 = arith.constant 0 : i32
    %c0_i32_0 = arith.constant 0 : i32
    %c0_i32_1 = arith.constant 0 : i32
    return %c0_i32, %c0_i32_0 : i32, i32
  }
  func.func @transform_2(%arg0: i32) -> (i32, i32) {
    %c0_i32 = arith.constant 0 : i32
    %c0_i32_0 = arith.constant 0 : i32
    %c0_i32_1 = arith.constant 0 : i32
    return %c0_i32, %c0_i32_0 : i32, i32
  }
  func.func @transform_3(%arg0: i32) -> (i32, i32) {
    %c0_i32 = arith.constant 0 : i32
    %c0_i32_0 = arith.constant 0 : i32
    return %arg0, %c0_i32 : i32, i32
  }
}

</mosaic_0001>

<bundles_post_ra>
// kernel: tpu_custom_call.1
= control target key start
LH: loop header
LB: loop body
LE: loop exit
PB: predicated region body
PF: predicated region fallthrough
CT: control target
= control target key end

     0   :  { %s187_s0 = inlined_call_operand.vmem [shape: f32[16,32], index: 0, kind: input, shape index: {}]   ;;  %s188_s1 = inlined_call_operand.vmem [shape: f32[32,8], index: 1, kind: input, shape index: {}]   ;;  %s189_s2 = inlined_call_operand.vmem [shape: f32[8,128], index: 2, kind: input, shape index: {}]   ;;  %s190_s3 = inlined_call_operand.hbm [shape: f32[16,128], index: 3, kind: output, shape index: {}]  }
   0x1   :  { %v20_v0 = vld [vmem:[%s188_s1 + $0x18] sm:$0xff]  ;;  %v19_v1 = vld [vmem:[%s188_s1 + $0x10] sm:$0xff]  ;;  %v18_v2 = vld [vmem:[%s188_s1 + $0x8] sm:$0xff] }
   0x2   :  { %106 = vmatpush.msra.mxu2 %v20_v0  ;;  %40 = vmatpush.msra.mxu0 %v20_v0 }
   0x3   :  { %8 = vsyncpa [#allocation3], 0  ;;  %v17_v3 = vld [vmem:[%s188_s1] sm:$0xff]  ;;  %v16_v4 = vld [vmem:[%s187_s0 + $0x8] sm:$0xff]  ;;  %vm21_vm0 = vcmask 261120   ;;  %vm52_vm1 = vcmask 64512  }
   0x4   :  { %107 = vmatpush.msra.mxu2 %v19_v1  ;;  %41 = vmatpush.msra.mxu0 %v19_v1  ;;  %v15_v5 = vld [vmem:[%s187_s0] sm:$0xff]  ;;  %s140_s1 = smov [#allocation2]   ;;  %s90_s28 = sshll.u32 %s190_s3, 4  ;;  %s91_s28 = int_to_ptr.hbm [resolvable:$true] %s90_s28 }
   0x5   :  { %v51_v6 = vld [vmem:[%s189_s2] sm:$0xff]  ;;  %s88_s26 = sshll.u32 %s140_s1, 4  ;;  %s141_s2 = smov 128   ;;  %s89_s26 = int_to_ptr.vmem [resolvable:$true] %s88_s26 }
   0x6   :  { %108 = vmatpush.msra.mxu2 %v18_v2  ;;  %42 = vmatpush.msra.mxu0 %v18_v2  ;;  %s142_s29 = smov 8  }
   0x7   :  { %110 = vmatpush.msra.mxu3 %v51_v6  ;;  %74 = vmatpush.msra.mxu1 %v51_v6 }
   0x8   :  { %109 = vmatpush.msra.mxu2 %v17_v3  ;;  %43 = vmatpush.msra.mxu0 %v17_v3 }
   0x9   :  { %103 = vmatmul.msk.f32.vlgmr.msra.gmra.mxu2 %vm21_vm0, %v16_v4  ;;  %102 = vmatmul.msk.f32.vlgmr.msra.gmra.mxu0 %vm21_vm0, %v15_v5 }
  0x86   :  { %v45_v7 = vpop.f32.mrf.mxu0 }
  0x87   :  { %104 = vmatmul.msk.f32.vlgmr.msra.gmra.mxu1 %vm52_vm1, %v45_v7 }
  0x8c   :  { %v48_v8 = vpop.f32.mrf.mxu2 }
  0x8d   :  { %105 = vmatmul.msk.f32.vlgmr.msra.gmra.mxu3 %vm52_vm1, %v48_v8 }
 0x104   :  { %v76_v9 = vpop.f32.mrf.mxu1 }
 0x105   :  { %82 = vst [vmem:[#allocation2] sm:$0xff] %v76_v9 }
 0x110   :  { %v79_v10 = vpop.f32.mrf.mxu3 }
 0x111   :  { %83 = vst [vmem:[#allocation2 + $0x8] sm:$0xff] %v79_v10 }
 0x112   :  { %96 = dma.vmem_to_hbm [thread:$0]  %s89_s26, 256, %s91_s28, [#allocation3], %s141_s2, %s141_s2, %s142_s29  }
 0x113   :  { %138 = dma.done.wait [#allocation3], 256  }
 0x114   :  { %139 = vsyncadd [#allocation3], 4294967040 }
 0x115   :  { %101 = vsyncpa [#allocation3], 1 }

</bundles_post_ra>
